<compile_context>
chip_gen: v7x
topology: tpu7x:2x2x1
jax: 0.10.0
libtpu: 0.0.40
codegen_flags: <defaults>
</compile_context>

<pallas_src>
import jax
import jax.numpy as jnp
from jax import lax
from jax.experimental import pallas as pl
from jax.experimental.pallas import tpu as pltpu

TAG_PAD = 128  # lane-dense output width (last dim multiple of 128)


def lstm_tagger_kernel(sent_ref, emb_ref, wb_ref, wout_ref, out_ref):
    # sent_ref : SMEM (T,) int32 token ids
    # emb_ref  : VMEM (V, 1, E) f32 embedding table (leading dim dynamically indexed)
    # wb_ref   : VMEM (E+H+1, 4H) f32  = [W_ih^T ; W_hh^T ; (b_ih+b_hh)]
    # wout_ref : VMEM (H+1, TAG_PAD) f32 = [W_out^T zero-padded ; b_out padded with -1e30]
    # out_ref  : VMEM (T, TAG_PAD) f32 log-probs (first `tagset` lanes valid)
    T = out_ref.shape[0]
    E = emb_ref.shape[2]
    H4 = wb_ref.shape[1]
    H = H4 // 4

    # ---- Exact embedding gather: dynamic row loads driven by SMEM ids. -------
    rows = [emb_ref[sent_ref[t]] for t in range(T)]          # each (1, E)
    embeds = jnp.concatenate(rows, axis=0)                   # (T, E)

    # ---- Unpack packed weights (static slices on a VMEM ref: free views). ----
    w_ih_t = wb_ref[0:E, :]                                  # (E, 4H)
    w_hh_t = wb_ref[E:E + H, :]                              # (H, 4H)
    b = wb_ref[E + H:E + H + 1, :]                           # (1, 4H)

    # ---- Hoisted input projection for ALL timesteps: (T,E)@(E,4H). -----------
    x_proj = jnp.dot(embeds, w_ih_t,
                     preferred_element_type=jnp.float32) + b  # (T, 4H)

    # ---- Serial LSTM recurrence, fully unrolled; h/c stay in vregs. ----------
    h = jnp.zeros((1, H), jnp.float32)   # self.hidden = (zeros, zeros)
    c = jnp.zeros((1, H), jnp.float32)
    hs = []
    for t in range(T):
        gates = x_proj[t:t + 1, :] + jnp.dot(
            h, w_hh_t, preferred_element_type=jnp.float32)    # (1, 4H)
        sig = jax.nn.sigmoid(gates)      # one EUP push covers i, f, o
        tnh = jnp.tanh(gates)            # one EUP push covers g
        i_g = sig[:, 0:H]
        f_g = sig[:, H:2 * H]
        g_g = tnh[:, 2 * H:3 * H]
        o_g = sig[:, 3 * H:4 * H]
        c = f_g * c + i_g * g_g
        h = o_g * jnp.tanh(c)
        hs.append(h)                      # vreg-resident, no VMEM round trip
    h_all = jnp.concatenate(hs, axis=0)  # (T, H)

    # ---- Batched hidden2tag + log_softmax; single lane-dense (T,128) store. --
    w_out_t = wout_ref[0:H, :]           # (H, TAG_PAD), zero-padded columns
    b_out = wout_ref[H:H + 1, :]         # (1, TAG_PAD), -1e30 on padded lanes
    tag = jnp.dot(h_all, w_out_t,
                  preferred_element_type=jnp.float32) + b_out  # (T, TAG_PAD)
    m = jnp.max(tag, axis=-1, keepdims=True)                   # pad lanes are -1e30
    lse = m + jnp.log(jnp.sum(jnp.exp(tag - m), axis=-1, keepdims=True))
    out_ref[...] = (tag - lse).astype(out_ref.dtype)


def prepare_params(params):
    """One-time packing of module parameters (hoisted out of the per-call path)."""
    emb_table, w_ih, w_hh, b_ih, b_hh, w_out, b_out = params
    V, E = emb_table.shape
    H = w_hh.shape[1]
    tagset = w_out.shape[0]
    assert tagset <= TAG_PAD

    emb3 = emb_table.astype(jnp.float32).reshape(V, 1, E)     # (V,1,E) for dynamic row loads

    w_ih_t = jnp.transpose(w_ih)                              # (E, 4H)
    w_hh_t = jnp.transpose(w_hh)                              # (H, 4H)
    b = (b_ih + b_hh).reshape(1, -1)                          # (1, 4H)
    big_w = jnp.concatenate([w_ih_t, w_hh_t, b], axis=0)      # (E+H+1, 4H)

    w_out_pad = jnp.zeros((H, TAG_PAD), jnp.float32).at[:, :tagset].set(jnp.transpose(w_out))
    b_out_pad = jnp.full((1, TAG_PAD), -1e30, jnp.float32).at[0, :tagset].set(b_out)
    big_out = jnp.concatenate([w_out_pad, b_out_pad], axis=0)  # (H+1, TAG_PAD)

    return emb3, big_w, big_out, tagset


def lstm_tagger_forward(sentence, prepared):
    """sentence: (T,) int32 token ids. Returns (T, tagset) log-probs."""
    emb3, big_w, big_out, tagset = prepared
    T = int(sentence.shape[0])
    sent = sentence.astype(jnp.int32)

    vmem = pl.BlockSpec(memory_space=pltpu.MemorySpace.VMEM)
    smem = pl.BlockSpec(memory_space=pltpu.MemorySpace.SMEM)

    out_padded = pl.pallas_call(
        lstm_tagger_kernel,
        out_shape=jax.ShapeDtypeStruct((T, TAG_PAD), jnp.float32),
        in_specs=[smem, vmem, vmem, vmem],
        out_specs=vmem,
    )(sent, emb3, big_w, big_out)
    return out_padded[:, :tagset]
    # TODO(synk): for v7x throughput, batch several sentences and add a leading
    # "parallel" grid axis to shard across both TensorCores (batch=1 here).


def lstm_tagger_reference(sentence, params):
    """Pure-JAX reference matching the PyTorch LSTMTagger forward."""
    emb_table, w_ih, w_hh, b_ih, b_hh, w_out, b_out = params
    H = w_hh.shape[1]
    embeds = emb_table[sentence]                              # (T, E)

    def step(carry, x_t):
        h, c = carry
        gates = x_t @ w_ih.T + h @ w_hh.T + b_ih + b_hh
        i = jax.nn.sigmoid(gates[0 * H:1 * H])
        f = jax.nn.sigmoid(gates[1 * H:2 * H])
        g = jnp.tanh(gates[2 * H:3 * H])
        o = jax.nn.sigmoid(gates[3 * H:4 * H])
        c = f * c + i * g
        h = o * jnp.tanh(c)
        return (h, c), h

    (_, _), hs = lax.scan(step, (jnp.zeros(H, jnp.float32), jnp.zeros(H, jnp.float32)), embeds)
    tag = hs @ w_out.T + b_out
    return jax.nn.log_softmax(tag, axis=-1)


def init_params(key, vocab_size, embedding_dim, hidden_dim, tagset_size):
    ks = jax.random.split(key, 7)
    scale = 0.1
    emb_table = scale * jax.random.normal(ks[0], (vocab_size, embedding_dim), jnp.float32)
    w_ih = scale * jax.random.normal(ks[1], (4 * hidden_dim, embedding_dim), jnp.float32)
    w_hh = scale * jax.random.normal(ks[2], (4 * hidden_dim, hidden_dim), jnp.float32)
    b_ih = scale * jax.random.normal(ks[3], (4 * hidden_dim,), jnp.float32)
    b_hh = scale * jax.random.normal(ks[4], (4 * hidden_dim,), jnp.float32)
    w_out = scale * jax.random.normal(ks[5], (tagset_size, hidden_dim), jnp.float32)
    b_out = scale * jax.random.normal(ks[6], (tagset_size,), jnp.float32)
    return (emb_table, w_ih, w_hh, b_ih, b_hh, w_out, b_out)


if __name__ == "__main__":
    # Small shapes consistent with the module's forward (batch = 1, folded out).
    SEQ_LEN = 8
    EMBEDDING_DIM = 32
    HIDDEN_DIM = 32
    VOCAB_SIZE = 16
    TAGSET_SIZE = 8

    key = jax.random.PRNGKey(0)
    pkey, skey = jax.random.split(key)
    params = init_params(pkey, VOCAB_SIZE, EMBEDDING_DIM, HIDDEN_DIM, TAGSET_SIZE)
    sentence = jax.random.randint(skey, (SEQ_LEN,), 0, VOCAB_SIZE, dtype=jnp.int32)

    prepared = prepare_params(params)           # one-time packing, off the call path
    tag_scores = lstm_tagger_forward(sentence, prepared)
    jax.block_until_ready(tag_scores)

    assert tag_scores.shape == (SEQ_LEN, TAGSET_SIZE)
    # log_softmax rows must sum to ~1 in prob space (sanity on semantics).
    assert jnp.allclose(jnp.sum(jnp.exp(tag_scores), axis=1), 1.0, atol=1e-4)
    # Match the pure-JAX reference of the PyTorch module.
    ref = lstm_tagger_reference(sentence, params)
    assert jnp.allclose(tag_scores, ref, atol=1e-3, rtol=1e-3)
    print("KERNEL_OK")
</pallas_src>

<mosaic_0001>
module attributes {stable_mosaic.version = 11 : i64} {
  func.func @lstm_tagger_kernel(%arg0: memref<8xi32, #tpu.memory_space<smem>>, %arg1: memref<16x1x32xf32, #tpu.memory_space<vmem>>, %arg2: memref<65x128xf32, #tpu.memory_space<vmem>>, %arg3: memref<33x128xf32, #tpu.memory_space<vmem>>, %arg4: memref<8x128xf32, #tpu.memory_space<vmem>>) attributes {dimension_semantics = [], scalar_prefetch = 0 : i64, scratch_operands = 0 : i64, tpu.core_type = #tpu.core_type<tc>} {
    %c0 = arith.constant 0 : index
    %0 = memref.load %arg0[%c0] : memref<8xi32, #tpu.memory_space<smem>>
    %1 = arith.index_cast %0 : i32 to index
    %c0_0 = arith.constant 0 : index
    %c0_1 = arith.constant 0 : index
    %2 = vector.load %arg1[%1, %c0_0, %c0_1] : memref<16x1x32xf32, #tpu.memory_space<vmem>>, vector<1x1x32xf32>
    %3 = vector.shape_cast %2 : vector<1x1x32xf32> to vector<1x32xf32>
    %c1 = arith.constant 1 : index
    %4 = memref.load %arg0[%c1] : memref<8xi32, #tpu.memory_space<smem>>
    %5 = arith.index_cast %4 : i32 to index
    %c0_2 = arith.constant 0 : index
    %c0_3 = arith.constant 0 : index
    %6 = vector.load %arg1[%5, %c0_2, %c0_3] : memref<16x1x32xf32, #tpu.memory_space<vmem>>, vector<1x1x32xf32>
    %7 = vector.shape_cast %6 : vector<1x1x32xf32> to vector<1x32xf32>
    %c2 = arith.constant 2 : index
    %8 = memref.load %arg0[%c2] : memref<8xi32, #tpu.memory_space<smem>>
    %9 = arith.index_cast %8 : i32 to index
    %c0_4 = arith.constant 0 : index
    %c0_5 = arith.constant 0 : index
    %10 = vector.load %arg1[%9, %c0_4, %c0_5] : memref<16x1x32xf32, #tpu.memory_space<vmem>>, vector<1x1x32xf32>
    %11 = vector.shape_cast %10 : vector<1x1x32xf32> to vector<1x32xf32>
    %c3 = arith.constant 3 : index
    %12 = memref.load %arg0[%c3] : memref<8xi32, #tpu.memory_space<smem>>
    %13 = arith.index_cast %12 : i32 to index
    %c0_6 = arith.constant 0 : index
    %c0_7 = arith.constant 0 : index
    %14 = vector.load %arg1[%13, %c0_6, %c0_7] : memref<16x1x32xf32, #tpu.memory_space<vmem>>, vector<1x1x32xf32>
    %15 = vector.shape_cast %14 : vector<1x1x32xf32> to vector<1x32xf32>
    %c4 = arith.constant 4 : index
    %16 = memref.load %arg0[%c4] : memref<8xi32, #tpu.memory_space<smem>>
    %17 = arith.index_cast %16 : i32 to index
    %c0_8 = arith.constant 0 : index
    %c0_9 = arith.constant 0 : index
    %18 = vector.load %arg1[%17, %c0_8, %c0_9] : memref<16x1x32xf32, #tpu.memory_space<vmem>>, vector<1x1x32xf32>
    %19 = vector.shape_cast %18 : vector<1x1x32xf32> to vector<1x32xf32>
    %c5 = arith.constant 5 : index
    %20 = memref.load %arg0[%c5] : memref<8xi32, #tpu.memory_space<smem>>
    %21 = arith.index_cast %20 : i32 to index
    %c0_10 = arith.constant 0 : index
    %c0_11 = arith.constant 0 : index
    %22 = vector.load %arg1[%21, %c0_10, %c0_11] : memref<16x1x32xf32, #tpu.memory_space<vmem>>, vector<1x1x32xf32>
    %23 = vector.shape_cast %22 : vector<1x1x32xf32> to vector<1x32xf32>
    %c6 = arith.constant 6 : index
    %24 = memref.load %arg0[%c6] : memref<8xi32, #tpu.memory_space<smem>>
    %25 = arith.index_cast %24 : i32 to index
    %c0_12 = arith.constant 0 : index
    %c0_13 = arith.constant 0 : index
    %26 = vector.load %arg1[%25, %c0_12, %c0_13] : memref<16x1x32xf32, #tpu.memory_space<vmem>>, vector<1x1x32xf32>
    %27 = vector.shape_cast %26 : vector<1x1x32xf32> to vector<1x32xf32>
    %c7 = arith.constant 7 : index
    %28 = memref.load %arg0[%c7] : memref<8xi32, #tpu.memory_space<smem>>
    %29 = arith.index_cast %28 : i32 to index
    %c0_14 = arith.constant 0 : index
    %c0_15 = arith.constant 0 : index
    %30 = vector.load %arg1[%29, %c0_14, %c0_15] : memref<16x1x32xf32, #tpu.memory_space<vmem>>, vector<1x1x32xf32>
    %31 = vector.shape_cast %30 : vector<1x1x32xf32> to vector<1x32xf32>
    %32 = tpu.concatenate %3, %7, %11, %15, %19, %23, %27, %31 in 0 : vector<1x32xf32>, vector<1x32xf32>, vector<1x32xf32>, vector<1x32xf32>, vector<1x32xf32>, vector<1x32xf32>, vector<1x32xf32>, vector<1x32xf32> -> vector<8x32xf32>
    %c0_16 = arith.constant 0 : index
    %c0_17 = arith.constant 0 : index
    %33 = vector.load %arg2[%c0_16, %c0_17] : memref<65x128xf32, #tpu.memory_space<vmem>>, vector<32x128xf32>
    %c32 = arith.constant 32 : index
    %c0_18 = arith.constant 0 : index
    %34 = vector.load %arg2[%c32, %c0_18] : memref<65x128xf32, #tpu.memory_space<vmem>>, vector<32x128xf32>
    %c64 = arith.constant 64 : index
    %c0_19 = arith.constant 0 : index
    %35 = vector.load %arg2[%c64, %c0_19] : memref<65x128xf32, #tpu.memory_space<vmem>>, vector<1x128xf32>
    %cst = arith.constant dense<0.000000e+00> : vector<8x128xf32>
    %36 = tpu.matmul %32, %33, %cst {dimension_numbers = #tpu.dot_dimension_numbers<[1], [0], [0], [1], [0, 0, 1, 1], [], []>} : vector<8x32xf32>, vector<32x128xf32>, vector<8x128xf32> -> vector<8x128xf32>
    %37 = vector.broadcast %35 : vector<1x128xf32> to vector<8x128xf32>
    %38 = arith.addf %36, %37 : vector<8x128xf32>
    %cst_20 = arith.constant 0.000000e+00 : f32
    %39 = vector.broadcast %cst_20 : f32 to vector<1x32xf32>
    %cst_21 = arith.constant 0.000000e+00 : f32
    %40 = vector.broadcast %cst_21 : f32 to vector<1x32xf32>
    %41 = vector.extract_strided_slice %38 {offsets = [0, 0], sizes = [1, 128], strides = [1, 1]} : vector<8x128xf32> to vector<1x128xf32>
    %cst_22 = arith.constant dense<0.000000e+00> : vector<1x128xf32>
    %42 = tpu.matmul %39, %34, %cst_22 {dimension_numbers = #tpu.dot_dimension_numbers<[1], [0], [0], [1], [0, 0, 1, 1], [], []>} : vector<1x32xf32>, vector<32x128xf32>, vector<1x128xf32> -> vector<1x128xf32>
    %43 = arith.addf %41, %42 : vector<1x128xf32>
    %44 = arith.negf %43 : vector<1x128xf32>
    %45 = math.exp %44 : vector<1x128xf32>
    %cst_23 = arith.constant 1.000000e+00 : f32
    %46 = vector.broadcast %cst_23 : f32 to vector<1x128xf32>
    %47 = arith.addf %46, %45 : vector<1x128xf32>
    %48 = arith.divf %46, %47 : vector<1x128xf32>
    %49 = math.tanh %43 : vector<1x128xf32>
    %50 = vector.extract_strided_slice %48 {offsets = [0, 0], sizes = [1, 32], strides = [1, 1]} : vector<1x128xf32> to vector<1x32xf32>
    %51 = vector.extract_strided_slice %48 {offsets = [0, 32], sizes = [1, 32], strides = [1, 1]} : vector<1x128xf32> to vector<1x32xf32>
    %52 = vector.extract_strided_slice %49 {offsets = [0, 64], sizes = [1, 32], strides = [1, 1]} : vector<1x128xf32> to vector<1x32xf32>
    %53 = vector.extract_strided_slice %48 {offsets = [0, 96], sizes = [1, 32], strides = [1, 1]} : vector<1x128xf32> to vector<1x32xf32>
    %54 = arith.mulf %51, %40 : vector<1x32xf32>
    %55 = arith.mulf %50, %52 : vector<1x32xf32>
    %56 = arith.addf %54, %55 : vector<1x32xf32>
    %57 = math.tanh %56 : vector<1x32xf32>
    %58 = arith.mulf %53, %57 : vector<1x32xf32>
    %59 = vector.extract_strided_slice %38 {offsets = [1, 0], sizes = [1, 128], strides = [1, 1]} : vector<8x128xf32> to vector<1x128xf32>
    %cst_24 = arith.constant dense<0.000000e+00> : vector<1x128xf32>
    %60 = tpu.matmul %58, %34, %cst_24 {dimension_numbers = #tpu.dot_dimension_numbers<[1], [0], [0], [1], [0, 0, 1, 1], [], []>} : vector<1x32xf32>, vector<32x128xf32>, vector<1x128xf32> -> vector<1x128xf32>
    %61 = arith.addf %59, %60 : vector<1x128xf32>
    %62 = arith.negf %61 : vector<1x128xf32>
    %63 = math.exp %62 : vector<1x128xf32>
    %cst_25 = arith.constant 1.000000e+00 : f32
    %64 = vector.broadcast %cst_25 : f32 to vector<1x128xf32>
    %65 = arith.addf %64, %63 : vector<1x128xf32>
    %66 = arith.divf %64, %65 : vector<1x128xf32>
    %67 = math.tanh %61 : vector<1x128xf32>
    %68 = vector.extract_strided_slice %66 {offsets = [0, 0], sizes = [1, 32], strides = [1, 1]} : vector<1x128xf32> to vector<1x32xf32>
    %69 = vector.extract_strided_slice %66 {offsets = [0, 32], sizes = [1, 32], strides = [1, 1]} : vector<1x128xf32> to vector<1x32xf32>
    %70 = vector.extract_strided_slice %67 {offsets = [0, 64], sizes = [1, 32], strides = [1, 1]} : vector<1x128xf32> to vector<1x32xf32>
    %71 = vector.extract_strided_slice %66 {offsets = [0, 96], sizes = [1, 32], strides = [1, 1]} : vector<1x128xf32> to vector<1x32xf32>
    %72 = arith.mulf %69, %56 : vector<1x32xf32>
    %73 = arith.mulf %68, %70 : vector<1x32xf32>
    %74 = arith.addf %72, %73 : vector<1x32xf32>
    %75 = math.tanh %74 : vector<1x32xf32>
    %76 = arith.mulf %71, %75 : vector<1x32xf32>
    %77 = vector.extract_strided_slice %38 {offsets = [2, 0], sizes = [1, 128], strides = [1, 1]} : vector<8x128xf32> to vector<1x128xf32>
    %cst_26 = arith.constant dense<0.000000e+00> : vector<1x128xf32>
    %78 = tpu.matmul %76, %34, %cst_26 {dimension_numbers = #tpu.dot_dimension_numbers<[1], [0], [0], [1], [0, 0, 1, 1], [], []>} : vector<1x32xf32>, vector<32x128xf32>, vector<1x128xf32> -> vector<1x128xf32>
    %79 = arith.addf %77, %78 : vector<1x128xf32>
    %80 = arith.negf %79 : vector<1x128xf32>
    %81 = math.exp %80 : vector<1x128xf32>
    %cst_27 = arith.constant 1.000000e+00 : f32
    %82 = vector.broadcast %cst_27 : f32 to vector<1x128xf32>
    %83 = arith.addf %82, %81 : vector<1x128xf32>
    %84 = arith.divf %82, %83 : vector<1x128xf32>
    %85 = math.tanh %79 : vector<1x128xf32>
    %86 = vector.extract_strided_slice %84 {offsets = [0, 0], sizes = [1, 32], strides = [1, 1]} : vector<1x128xf32> to vector<1x32xf32>
    %87 = vector.extract_strided_slice %84 {offsets = [0, 32], sizes = [1, 32], strides = [1, 1]} : vector<1x128xf32> to vector<1x32xf32>
    %88 = vector.extract_strided_slice %85 {offsets = [0, 64], sizes = [1, 32], strides = [1, 1]} : vector<1x128xf32> to vector<1x32xf32>
    %89 = vector.extract_strided_slice %84 {offsets = [0, 96], sizes = [1, 32], strides = [1, 1]} : vector<1x128xf32> to vector<1x32xf32>
    %90 = arith.mulf %87, %74 : vector<1x32xf32>
    %91 = arith.mulf %86, %88 : vector<1x32xf32>
    %92 = arith.addf %90, %91 : vector<1x32xf32>
    %93 = math.tanh %92 : vector<1x32xf32>
    %94 = arith.mulf %89, %93 : vector<1x32xf32>
    %95 = vector.extract_strided_slice %38 {offsets = [3, 0], sizes = [1, 128], strides = [1, 1]} : vector<8x128xf32> to vector<1x128xf32>
    %cst_28 = arith.constant dense<0.000000e+00> : vector<1x128xf32>
    %96 = tpu.matmul %94, %34, %cst_28 {dimension_numbers = #tpu.dot_dimension_numbers<[1], [0], [0], [1], [0, 0, 1, 1], [], []>} : vector<1x32xf32>, vector<32x128xf32>, vector<1x128xf32> -> vector<1x128xf32>
    %97 = arith.addf %95, %96 : vector<1x128xf32>
    %98 = arith.negf %97 : vector<1x128xf32>
    %99 = math.exp %98 : vector<1x128xf32>
    %cst_29 = arith.constant 1.000000e+00 : f32
    %100 = vector.broadcast %cst_29 : f32 to vector<1x128xf32>
    %101 = arith.addf %100, %99 : vector<1x128xf32>
    %102 = arith.divf %100, %101 : vector<1x128xf32>
    %103 = math.tanh %97 : vector<1x128xf32>
    %104 = vector.extract_strided_slice %102 {offsets = [0, 0], sizes = [1, 32], strides = [1, 1]} : vector<1x128xf32> to vector<1x32xf32>
    %105 = vector.extract_strided_slice %102 {offsets = [0, 32], sizes = [1, 32], strides = [1, 1]} : vector<1x128xf32> to vector<1x32xf32>
    %106 = vector.extract_strided_slice %103 {offsets = [0, 64], sizes = [1, 32], strides = [1, 1]} : vector<1x128xf32> to vector<1x32xf32>
    %107 = vector.extract_strided_slice %102 {offsets = [0, 96], sizes = [1, 32], strides = [1, 1]} : vector<1x128xf32> to vector<1x32xf32>
    %108 = arith.mulf %105, %92 : vector<1x32xf32>
    %109 = arith.mulf %104, %106 : vector<1x32xf32>
    %110 = arith.addf %108, %109 : vector<1x32xf32>
    %111 = math.tanh %110 : vector<1x32xf32>
    %112 = arith.mulf %107, %111 : vector<1x32xf32>
    %113 = vector.extract_strided_slice %38 {offsets = [4, 0], sizes = [1, 128], strides = [1, 1]} : vector<8x128xf32> to vector<1x128xf32>
    %cst_30 = arith.constant dense<0.000000e+00> : vector<1x128xf32>
    %114 = tpu.matmul %112, %34, %cst_30 {dimension_numbers = #tpu.dot_dimension_numbers<[1], [0], [0], [1], [0, 0, 1, 1], [], []>} : vector<1x32xf32>, vector<32x128xf32>, vector<1x128xf32> -> vector<1x128xf32>
    %115 = arith.addf %113, %114 : vector<1x128xf32>
    %116 = arith.negf %115 : vector<1x128xf32>
    %117 = math.exp %116 : vector<1x128xf32>
    %cst_31 = arith.constant 1.000000e+00 : f32
    %118 = vector.broadcast %cst_31 : f32 to vector<1x128xf32>
    %119 = arith.addf %118, %117 : vector<1x128xf32>
    %120 = arith.divf %118, %119 : vector<1x128xf32>
    %121 = math.tanh %115 : vector<1x128xf32>
    %122 = vector.extract_strided_slice %120 {offsets = [0, 0], sizes = [1, 32], strides = [1, 1]} : vector<1x128xf32> to vector<1x32xf32>
    %123 = vector.extract_strided_slice %120 {offsets = [0, 32], sizes = [1, 32], strides = [1, 1]} : vector<1x128xf32> to vector<1x32xf32>
    %124 = vector.extract_strided_slice %121 {offsets = [0, 64], sizes = [1, 32], strides = [1, 1]} : vector<1x128xf32> to vector<1x32xf32>
    %125 = vector.extract_strided_slice %120 {offsets = [0, 96], sizes = [1, 32], strides = [1, 1]} : vector<1x128xf32> to vector<1x32xf32>
    %126 = arith.mulf %123, %110 : vector<1x32xf32>
    %127 = arith.mulf %122, %124 : vector<1x32xf32>
    %128 = arith.addf %126, %127 : vector<1x32xf32>
    %129 = math.tanh %128 : vector<1x32xf32>
    %130 = arith.mulf %125, %129 : vector<1x32xf32>
    %131 = vector.extract_strided_slice %38 {offsets = [5, 0], sizes = [1, 128], strides = [1, 1]} : vector<8x128xf32> to vector<1x128xf32>
    %cst_32 = arith.constant dense<0.000000e+00> : vector<1x128xf32>
    %132 = tpu.matmul %130, %34, %cst_32 {dimension_numbers = #tpu.dot_dimension_numbers<[1], [0], [0], [1], [0, 0, 1, 1], [], []>} : vector<1x32xf32>, vector<32x128xf32>, vector<1x128xf32> -> vector<1x128xf32>
    %133 = arith.addf %131, %132 : vector<1x128xf32>
    %134 = arith.negf %133 : vector<1x128xf32>
    %135 = math.exp %134 : vector<1x128xf32>
    %cst_33 = arith.constant 1.000000e+00 : f32
    %136 = vector.broadcast %cst_33 : f32 to vector<1x128xf32>
    %137 = arith.addf %136, %135 : vector<1x128xf32>
    %138 = arith.divf %136, %137 : vector<1x128xf32>
    %139 = math.tanh %133 : vector<1x128xf32>
    %140 = vector.extract_strided_slice %138 {offsets = [0, 0], sizes = [1, 32], strides = [1, 1]} : vector<1x128xf32> to vector<1x32xf32>
    %141 = vector.extract_strided_slice %138 {offsets = [0, 32], sizes = [1, 32], strides = [1, 1]} : vector<1x128xf32> to vector<1x32xf32>
    %142 = vector.extract_strided_slice %139 {offsets = [0, 64], sizes = [1, 32], strides = [1, 1]} : vector<1x128xf32> to vector<1x32xf32>
    %143 = vector.extract_strided_slice %138 {offsets = [0, 96], sizes = [1, 32], strides = [1, 1]} : vector<1x128xf32> to vector<1x32xf32>
    %144 = arith.mulf %141, %128 : vector<1x32xf32>
    %145 = arith.mulf %140, %142 : vector<1x32xf32>
    %146 = arith.addf %144, %145 : vector<1x32xf32>
    %147 = math.tanh %146 : vector<1x32xf32>
    %148 = arith.mulf %143, %147 : vector<1x32xf32>
    %149 = vector.extract_strided_slice %38 {offsets = [6, 0], sizes = [1, 128], strides = [1, 1]} : vector<8x128xf32> to vector<1x128xf32>
    %cst_34 = arith.constant dense<0.000000e+00> : vector<1x128xf32>
    %150 = tpu.matmul %148, %34, %cst_34 {dimension_numbers = #tpu.dot_dimension_numbers<[1], [0], [0], [1], [0, 0, 1, 1], [], []>} : vector<1x32xf32>, vector<32x128xf32>, vector<1x128xf32> -> vector<1x128xf32>
    %151 = arith.addf %149, %150 : vector<1x128xf32>
    %152 = arith.negf %151 : vector<1x128xf32>
    %153 = math.exp %152 : vector<1x128xf32>
    %cst_35 = arith.constant 1.000000e+00 : f32
    %154 = vector.broadcast %cst_35 : f32 to vector<1x128xf32>
    %155 = arith.addf %154, %153 : vector<1x128xf32>
    %156 = arith.divf %154, %155 : vector<1x128xf32>
    %157 = math.tanh %151 : vector<1x128xf32>
    %158 = vector.extract_strided_slice %156 {offsets = [0, 0], sizes = [1, 32], strides = [1, 1]} : vector<1x128xf32> to vector<1x32xf32>
    %159 = vector.extract_strided_slice %156 {offsets = [0, 32], sizes = [1, 32], strides = [1, 1]} : vector<1x128xf32> to vector<1x32xf32>
    %160 = vector.extract_strided_slice %157 {offsets = [0, 64], sizes = [1, 32], strides = [1, 1]} : vector<1x128xf32> to vector<1x32xf32>
    %161 = vector.extract_strided_slice %156 {offsets = [0, 96], sizes = [1, 32], strides = [1, 1]} : vector<1x128xf32> to vector<1x32xf32>
    %162 = arith.mulf %159, %146 : vector<1x32xf32>
    %163 = arith.mulf %158, %160 : vector<1x32xf32>
    %164 = arith.addf %162, %163 : vector<1x32xf32>
    %165 = math.tanh %164 : vector<1x32xf32>
    %166 = arith.mulf %161, %165 : vector<1x32xf32>
    %167 = vector.extract_strided_slice %38 {offsets = [7, 0], sizes = [1, 128], strides = [1, 1]} : vector<8x128xf32> to vector<1x128xf32>
    %cst_36 = arith.constant dense<0.000000e+00> : vector<1x128xf32>
    %168 = tpu.matmul %166, %34, %cst_36 {dimension_numbers = #tpu.dot_dimension_numbers<[1], [0], [0], [1], [0, 0, 1, 1], [], []>} : vector<1x32xf32>, vector<32x128xf32>, vector<1x128xf32> -> vector<1x128xf32>
    %169 = arith.addf %167, %168 : vector<1x128xf32>
    %170 = arith.negf %169 : vector<1x128xf32>
    %171 = math.exp %170 : vector<1x128xf32>
    %cst_37 = arith.constant 1.000000e+00 : f32
    %172 = vector.broadcast %cst_37 : f32 to vector<1x128xf32>
    %173 = arith.addf %172, %171 : vector<1x128xf32>
    %174 = arith.divf %172, %173 : vector<1x128xf32>
    %175 = math.tanh %169 : vector<1x128xf32>
    %176 = vector.extract_strided_slice %174 {offsets = [0, 0], sizes = [1, 32], strides = [1, 1]} : vector<1x128xf32> to vector<1x32xf32>
    %177 = vector.extract_strided_slice %174 {offsets = [0, 32], sizes = [1, 32], strides = [1, 1]} : vector<1x128xf32> to vector<1x32xf32>
    %178 = vector.extract_strided_slice %175 {offsets = [0, 64], sizes = [1, 32], strides = [1, 1]} : vector<1x128xf32> to vector<1x32xf32>
    %179 = vector.extract_strided_slice %174 {offsets = [0, 96], sizes = [1, 32], strides = [1, 1]} : vector<1x128xf32> to vector<1x32xf32>
    %180 = arith.mulf %177, %164 : vector<1x32xf32>
    %181 = arith.mulf %176, %178 : vector<1x32xf32>
    %182 = arith.addf %180, %181 : vector<1x32xf32>
    %183 = math.tanh %182 : vector<1x32xf32>
    %184 = arith.mulf %179, %183 : vector<1x32xf32>
    %185 = tpu.concatenate %58, %76, %94, %112, %130, %148, %166, %184 in 0 : vector<1x32xf32>, vector<1x32xf32>, vector<1x32xf32>, vector<1x32xf32>, vector<1x32xf32>, vector<1x32xf32>, vector<1x32xf32>, vector<1x32xf32> -> vector<8x32xf32>
    %c0_38 = arith.constant 0 : index
    %c0_39 = arith.constant 0 : index
    %186 = vector.load %arg3[%c0_38, %c0_39] : memref<33x128xf32, #tpu.memory_space<vmem>>, vector<32x128xf32>
    %c32_40 = arith.constant 32 : index
    %c0_41 = arith.constant 0 : index
    %187 = vector.load %arg3[%c32_40, %c0_41] : memref<33x128xf32, #tpu.memory_space<vmem>>, vector<1x128xf32>
    %cst_42 = arith.constant dense<0.000000e+00> : vector<8x128xf32>
    %188 = tpu.matmul %185, %186, %cst_42 {dimension_numbers = #tpu.dot_dimension_numbers<[1], [0], [0], [1], [0, 0, 1, 1], [], []>} : vector<8x32xf32>, vector<32x128xf32>, vector<8x128xf32> -> vector<8x128xf32>
    %189 = vector.broadcast %187 : vector<1x128xf32> to vector<8x128xf32>
    %190 = arith.addf %188, %189 : vector<8x128xf32>
    %cst_43 = arith.constant dense<0xFF800000> : vector<8xf32>
    %191 = vector.multi_reduction <maximumf>, %190, %cst_43 [1] : vector<8x128xf32> to vector<8xf32>
    %192 = vector.shape_cast %191 : vector<8xf32> to vector<8x1xf32>
    %193 = vector.broadcast %192 : vector<8x1xf32> to vector<8x128xf32>
    %194 = arith.subf %190, %193 : vector<8x128xf32>
    %195 = math.exp %194 : vector<8x128xf32>
    %cst_44 = arith.constant dense<0.000000e+00> : vector<8xf32>
    %196 = vector.multi_reduction <add>, %195, %cst_44 [1] : vector<8x128xf32> to vector<8xf32>
    %197 = vector.shape_cast %196 : vector<8xf32> to vector<8x1xf32>
    %198 = math.log %197 : vector<8x1xf32>
    %199 = arith.addf %192, %198 : vector<8x1xf32>
    %200 = vector.broadcast %199 : vector<8x1xf32> to vector<8x128xf32>
    %201 = arith.subf %190, %200 : vector<8x128xf32>
    %c0_45 = arith.constant 0 : index
    %c0_46 = arith.constant 0 : index
    %202 = vector.load %arg4[%c0_45, %c0_46] : memref<8x128xf32, #tpu.memory_space<vmem>>, vector<8x128xf32>
    tpu.vector_store %arg4[%c0_45, %c0_46], %201 {strides = array<i32>} : memref<8x128xf32, #tpu.memory_space<vmem>>, vector<8x128xf32>,
    return
  }
}

</mosaic_0001>

<bundles_post_ra>
// kernel: tpu_custom_call.1
= control target key start
LH: loop header
LB: loop body
LE: loop exit
PB: predicated region body
PF: predicated region fallthrough
CT: control target
= control target key end

     0   :  { %9 = vsyncpa [#allocation5], 0  ;;  %s1890_s0 = inlined_call_operand.hbm [shape: s32[8], index: 0, kind: input, shape index: {}]   ;;  %s1891_s1 = inlined_call_operand.hbm [shape: f32[16,1,32], index: 1, kind: input, shape index: {}]   ;;  %s1892_s2 = inlined_call_operand.hbm [shape: f32[65,128], index: 2, kind: input, shape index: {}]   ;;  %s1893_s3 = inlined_call_operand.hbm [shape: f32[33,128], index: 3, kind: input, shape index: {}]   ;;  %s1894_s4 = inlined_call_operand.hbm [shape: f32[8,128], index: 4, kind: output, shape index: {}]  }
   0x1   :  { %10 = vsyncpa [#allocation3], 0 }
   0x2   :  { %11 = vsyncpa [#allocation8], 0 }
   0x3   :  { %12 = vsyncpa [#allocation4], 0  ;;  %s1652_s15 = smov [#allocation7]   ;;  %s1546_s19 = scalar_lea.hbm %s1892_s2, 1152 }
   0x4   :  { %s38_s16 = sshll.u32 %s1652_s15, 4  ;;  %p1547_p0 = scmp.ne.s32.totalorder %s1892_s2, %s1546_s19  ;;  %s39_s16 = int_to_ptr.vmem [resolvable:$true] %s38_s16 }
   0x5   :  { %p1550_p1 = scmp.lt.u32.totalorder %s1546_s19, %s1892_s2 }
   0x7   :  { %p1552_p2 = pnand %p1550_p1, %p1547_p0 }
   0x9   :  { %1555 = shalt.err (!%p1552_p2)
}
   0xa   :  { %s1556_s24 = scalar_lea.vmem %s39_s16, 1152  ;;  %p1561_p4 = scmp.lt.s32.totalorder %s39_s16, %s39_s16 }
   0xb   :  { %p1557_p3 = scmp.ne.s32.totalorder %s39_s16, %s1556_s24  ;;  %p1562_p5 = scmp.lt.s32.totalorder %s1556_s24, %s1556_s24 }
   0xd   :  { %p1563_p6 = por %p1562_p5, %p1561_p4 }
   0xf   :  { %p1564_p7 = pnand %p1563_p6, %p1557_p3 }
  0x11   :  { %1567 = shalt.err (!%p1564_p7)
}
  0x12   :  { %s1653_s25 = smov 128   ;;  %s1654_s26 = smov 8  }
  0x13   :  { %44 = dma.hbm_to_vmem [thread:$0]  %s1892_s2, 1152, %s39_s16, [#allocation8], %s1653_s25, %s1653_s25, %s1654_s26  }
  0x14   :  { %s1568_s5 = scalar_lea.hbm %s1890_s0, 16 }
  0x15   :  { %p1569_p8 = scmp.ne.s32.totalorder %s1890_s0, %s1568_s5  ;;  %p1572_p9 = scmp.lt.u32.totalorder %s1568_s5, %s1890_s0 }
  0x17   :  { %p1574_p10 = pnand %p1572_p9, %p1569_p8 }
  0x19   :  { %1577 = shalt.err (!%p1574_p10)
}
  0x1a   :  { %s1655_s10 = smov [#allocation2]   ;;  %s1656_s2 = smov [#allocation6]  }
  0x1b   :  { %20 = dma.hbm_to_smem %s1890_s0, 16, %s1655_s10, [#allocation5]  }
  0x1c   :  { %s26_s13 = sshll.u32 %s1656_s2, 4  ;;  %s1578_s16 = scalar_lea.hbm %s1891_s1, 256  ;;  %s27_s13 = int_to_ptr.vmem [resolvable:$true] %s26_s13 }
  0x1d   :  { %p1579_p11 = scmp.ne.s32.totalorder %s1891_s1, %s1578_s16  ;;  %p1582_p12 = scmp.lt.u32.totalorder %s1578_s16, %s1891_s1 }
  0x1f   :  { %p1584_p13 = pnand %p1582_p12, %p1579_p11 }
  0x21   :  { %1587 = shalt.err (!%p1584_p13)
}
  0x22   :  { %s1588_s21 = scalar_lea.vmem %s27_s13, 256  ;;  %p1593_p1 = scmp.lt.s32.totalorder %s27_s13, %s27_s13 }
  0x23   :  { %p1589_p0 = scmp.ne.s32.totalorder %s27_s13, %s1588_s21  ;;  %p1594_p2 = scmp.lt.s32.totalorder %s1588_s21, %s1588_s21 }
  0x25   :  { %p1595_p3 = por %p1594_p2, %p1593_p1 }
  0x27   :  { %p1596_p4 = pnand %p1595_p3, %p1589_p0 }
  0x29   :  { %1599 = shalt.err (!%p1596_p4)
}
  0x2a   :  { %s1657_s0 = smov 16   ;;  %s1658_s22 = smov 1  }
  0x2b   :  { %32 = dma.hbm_to_vmem [thread:$0]  %s1891_s1, 256, %s27_s13, [#allocation3], %s1657_s0, %s1657_s0, %s1658_s22  }
  0x2c   :  { %s1659_s27 = smov [#allocation9]   ;;  %s1600_s5 = scalar_lea.hbm %s1893_s3, 640 }
  0x2d   :  { %s50_s28 = sshll.u32 %s1659_s27, 4  ;;  %p1601_p5 = scmp.ne.s32.totalorder %s1893_s3, %s1600_s5  ;;  %s51_s28 = int_to_ptr.vmem [resolvable:$true] %s50_s28 }
  0x2e   :  { %p1604_p6 = scmp.lt.u32.totalorder %s1600_s5, %s1893_s3 }
  0x30   :  { %p1606_p7 = pnand %p1604_p6, %p1601_p5 }
  0x32   :  { %1609 = shalt.err (!%p1606_p7)
}
  0x33   :  { %s1610_s10 = scalar_lea.vmem %s51_s28, 640  ;;  %p1615_p9 = scmp.lt.s32.totalorder %s51_s28, %s51_s28 }
  0x34   :  { %p1611_p8 = scmp.ne.s32.totalorder %s51_s28, %s1610_s10  ;;  %p1616_p10 = scmp.lt.s32.totalorder %s1610_s10, %s1610_s10 }
  0x36   :  { %p1617_p11 = por %p1616_p10, %p1615_p9 }
  0x38   :  { %p1618_p12 = pnand %p1617_p11, %p1611_p8 }
  0x3a   :  { %1621 = shalt.err (!%p1618_p12)
}
  0x3b   :  { %56 = dma.hbm_to_vmem [thread:$0]  %s1893_s3, 640, %s51_s28, [#allocation8], %s1653_s25, %s1653_s25, %s1654_s26  }
  0x3c   :  { %1644 = dma.done.wait [#allocation5], 16  }
  0x3d   :  { %1645 = vsyncadd [#allocation5], 4294967280 }
  0x3e   :  { %1646 = dma.done.wait [#allocation3], 256  }
  0x3f   :  { %1647 = vsyncadd [#allocation3], 4294967040 }
  0x40   :  { %1648 = dma.done.wait [#allocation8], 1792  }
  0x41   :  { %1649 = vsyncadd [#allocation8], 4294965504 }
  0x42   :  { %69 = sfence }
  0x43   :  { %v150_v0 = vld [vmem:[#allocation7] sm:$0xff]  ;;  %v151_v1 = vld [vmem:[#allocation7 + $0x8] sm:$0xff]  ;;  %v1660_v3 = vmov 0.0|0.0   ;;  %v152_v6 = vld [vmem:[#allocation7 + $0x10] sm:$0xff]  ;;  %s70_s3 = sld [smem:[#allocation2]]  ;;  %vm1661_vm0 = vmmov 0  }
  0x44   :  { %v154_v2 = vld [vmem:[#allocation7 + $0x20] sm:$0xff]  ;;  %1404 = vmatprep.subr.bf16.mxu0 %v1660_v3  ;;  %v1405_v4 = vpack.c.bf16 %v151_v1, %v150_v0  ;;  %1410 = vmatprep.subr.bf16.mxu1 %v1660_v3  ;;  %v155_v5 = vld [vmem:[#allocation7 + $0x28] sm:$0xff]  ;;  %v153_v7 = vld [vmem:[#allocation7 + $0x18] sm:$0xff]  ;;  %v1662_v11 = vmov 0.0   ;;  %s1211_s25 = sld [smem:[#allocation2 + $0x1]]  ;;  %s1212_s26 = sld [smem:[#allocation2 + $0x2]] }
  0x45   :  { %v1747_v8 = vpack.c.bf16 %v155_v5, %v154_v2  ;;  %v156_v9 = vld [vmem:[#allocation7 + $0x30] sm:$0xff]  ;;  %v157_v10 = vld [vmem:[#allocation7 + $0x38] sm:$0xff]  ;;  %1302 = vmatprep.mubr.msk.f32.mxu0 %vm1661_vm0, %v1662_v11  ;;  %1313 = vmatprep.mubr.msk.f32.mxu1 %vm1661_vm0, %v1662_v11  ;;  %v1408_v12 = vpack.c.bf16 %v153_v7, %v152_v6  ;;  %s1213_s12 = sld [smem:[#allocation2 + $0x3]]  ;;  %s1214_s2 = sld [smem:[#allocation2 + $0x4]]  ;;  %vm136_vm1 = vcmask 1040384   ;;  %vm138_vm2 = vcmask 1041408  }
  0x46   :  { %1406 = vmatpush3.bf16.msra.mxu0 %v1405_v4  ;;  %v1755_v13 = vpack.c.bf16 %v157_v10, %v156_v9  ;;  %s1215_s13 = sld [smem:[#allocation2 + $0x5]]  ;;  %s1216_s14 = sld [smem:[#allocation2 + $0x6]]  ;;  %vm140_vm3 = vcmask 1042432   ;;  %vm142_vm4 = vcmask 1043456   ;;  %vm144_vm5 = vcmask 1044480  }
  0x47   :  { %1412 = vmatpush3.bf16.msra.mxu1 %v1747_v8  ;;  %1407 = vmatprep.subr.bf16.mxu0 %v1660_v3  ;;  %s1758_s15 = sld [smem:[#allocation2 + $0x7]]  ;;  %vm146_vm6 = vcmask 1045504   ;;  %vm148_vm7 = vcmask 1046528   ;;  %vm163_vm8 = vcmask 261120   ;;  %v1225_v31 = vld [vmem:[#allocation7 + $0x40] ss:$0 sm:$0xff] }
  0x48   :  { %1413 = vmatprep.subr.bf16.mxu1 %v1660_v3  ;;  %s1663_s23 = smov 64   ;;  %s1664_s24 = smov 32  }
  0x49   :  { %s71_s16 = scalar_lea.vmem [#allocation6], %s70_s3  ;;  %s1665_s27 = smov [#allocation10]  }
  0x4a   :  { %1409 = vmatpush3.bf16.msra.mxu0 %v1408_v12  ;;  %v72_v14 = vld [vmem:[%s71_s16] sm:$0x1]  ;;  %s74_s17 = scalar_lea.vmem [#allocation6], %s1211_s25  ;;  %s77_s18 = scalar_lea.vmem [#allocation6], %s1212_s26 }
  0x4b   :  { %1415 = vmatpush3.bf16.msra.mxu1 %v1755_v13  ;;  %1416 = vmatprep.subr.bf16.mxu0 %v1660_v3  ;;  %v1218_v15 = vld [vmem:[%s74_s17] ss:$0 sm:$0xff]  ;;  %s80_s19 = scalar_lea.vmem [#allocation6], %s1213_s12  ;;  %s83_s20 = scalar_lea.vmem [#allocation6], %s1214_s2 }
  0x4c   :  { %v1219_v16 = vld [vmem:[%s77_s18] ss:$0 sm:$0xff]  ;;  %1422 = vmatprep.subr.bf16.mxu1 %v1660_v3  ;;  %v137_v19 = vsel %vm136_vm1, %v72_v14, %v1218_v15  ;;  %s86_s21 = scalar_lea.vmem [#allocation6], %s1215_s13  ;;  %s89_s0 = scalar_lea.vmem [#allocation6], %s1216_s14 }
  0x4d   :  { %v1220_v17 = vld [vmem:[%s80_s19] ss:$0 sm:$0xff]  ;;  %v139_v21 = vsel %vm138_vm2, %v137_v19, %v1219_v16  ;;  %s92_s22 = scalar_lea.vmem [#allocation6], %s1758_s15  ;;  %s1192_s28 = sshll.u32 %s1665_s27, 4  ;;  %s1193_s28 = int_to_ptr.vmem [resolvable:$true] %s1192_s28 }
  0x4e   :  { %v1221_v18 = vld [vmem:[%s83_s20] ss:$0 sm:$0xff]  ;;  %1314 = vmatmul.mubr.f32.vlgmr.msra.gmra.mrb[0].mxu1 %v1662_v11  ;;  %v141_v23 = vsel %vm140_vm3, %v139_v21, %v1220_v17  ;;  %s1622_s29 = scalar_lea.vmem %s1193_s28, 128  ;;  %p1627_p0 = scmp.lt.s32.totalorder %s1193_s28, %s1193_s28 }
  0x4f   :  { %v1222_v20 = vld [vmem:[%s86_s21] ss:$0 sm:$0xff]  ;;  %1424 = vmatpush3.bf16.msra.mxu1 %v1747_v8  ;;  %1335 = vmatprep.mubr.msk.f32.mxu1 %vm1661_vm0, %v1662_v11  ;;  %v143_v25 = vsel %vm142_vm4, %v141_v23, %v1221_v18  ;;  %p1623_p13 = scmp.ne.s32.totalorder %s1193_s28, %s1622_s29  ;;  %p1628_p1 = scmp.lt.s32.totalorder %s1622_s29, %s1622_s29 }
  0x50   :  { %v1223_v22 = vld [vmem:[%s89_s0] ss:$0 sm:$0xff]  ;;  %1425 = vmatprep.subr.bf16.mxu1 %v1660_v3  ;;  %v145_v26 = vsel %vm144_vm5, %v143_v25, %v1222_v20 }
  0x51   :  { %v1224_v24 = vld [vmem:[%s92_s22] ss:$0 sm:$0xff]  ;;  %v147_v27 = vsel %vm146_vm6, %v145_v26, %v1223_v22  ;;  %p1629_p2 = por %p1628_p1, %p1627_p0 }
  0x52   :  { %v149_v28 = vsel %vm148_vm7, %v147_v27, %v1224_v24 }
  0x53   :  { %1427 = vmatpush3.bf16.msra.mxu1 %v1755_v13  ;;  %1303 = vmatmul.mubr.msk.f32.vlgmr.msra.gmra.mrb[0].mxu0 %vm163_vm8, %v149_v28  ;;  %p1630_p3 = pnand %p1629_p2, %p1623_p13 }
  0x54   :  { %1434 = vmatprep.subr.bf16.mxu1 %v1660_v3  ;;  %1418 = vmatpush3.bf16.msra.mxu0 %v1747_v8 }
  0x55   :  { %1324 = vmatprep.mubr.msk.f32.mxu0 %vm1661_vm0, %v1662_v11  ;;  %1419 = vmatprep.subr.bf16.mxu0 %v1660_v3 }
  0x58   :  { %1421 = vmatpush3.bf16.msra.mxu0 %v1755_v13 }
  0x59   :  { %1428 = vmatprep.subr.bf16.mxu0 %v1660_v3 }
 0x121   :  { %v306_v29 = vpop.f32.mrb[0].mxu1 }
 0x122   :  { %v1315_v30 = vpop.f32.mrb[1].mxu1 }
 0x126   :  { %v233_v32 = vpop.f32.mrb[0].mxu0 }
 0x127   :  { %v1785_v33 = vadd.f32 %v1225_v31, %v233_v32  ;;  %v1304_v34 = vpop.f32.mrb[1].mxu0 }
 0x129   :  { %v310_v35 = vadd.f32 %v306_v29, %v1785_v33 }
 0x12b   :  { %1478 = vtanh.f32 %v310_v35  ;;  %v1227_v37 = vmul.f32 -1.442695, %v310_v35 }
 0x12d   :  { %1480 = vpow2.f32 %v1227_v37 }
 0x135   :  { %v1479_v36 = vpop.eup %1478 }
 0x136   :  { %320 = vrot.lane.b32.xlu0 %v1479_v36, %s1663_s23 }
 0x137   :  { %v1481_v38 = vpop.eup %1480 }
 0x138   :  { %v314_v39 = vadd.f32 1.0, %v1481_v38 }
 0x13a   :  { %1482 = vrcp.f32 %v314_v39 }
 0x144   :  { %v1483_v40 = vpop.eup %1482 }
 0x145   :  { %v318_v43 = vmul.f32 0.0, %v1483_v40 }
 0x1a8   :  { %v321_v41 = vpop.permute.xlu0 %320 }
 0x1a9   :  { %v323_v42 = vmul.f32 %v1483_v40, %v321_v41 }
 0x1ab   :  { %325 = vrot.lane.b32.xlu0 %v323_v42, %s1664_s24 }
 0x21d   :  { %v326_v44 = vpop.permute.xlu0 %325 }
 0x21e   :  { %v328_v45 = vadd.f32 %v326_v44, %v318_v43 }
 0x220   :  { %1484 = vtanh.f32 %v328_v45  ;;  %v422_v61 = vrot.slane %v328_v45, 7 }
 0x22a   :  { %v1485_v46 = vpop.eup %1484 }
 0x22b   :  { %331 = vrot.lane.b32.xlu1 %v1485_v46, %s1663_s23 }
 0x29d   :  { %v332_v47 = vpop.permute.xlu1 %331 }
 0x29e   :  { %v1791_v48 = vmul.f32 %v1483_v40, %v332_v47 }
 0x2a0   :  { %336 = vrot.lane.b32.xlu1 %v1791_v48, %s1664_s24 }
 0x312   :  { %v337_v49 = vpop.permute.xlu1 %336 }
 0x313   :  { %1325 = vmatmul.mubr.msk.f32.vlgmr.msra.gmra.mrb[2].mxu0 %vm163_vm8, %v337_v49 }
 0x314   :  { %1430 = vmatpush3.bf16.msra.mxu0 %v1747_v8  ;;  %1346 = vmatprep.mubr.msk.f32.mxu0 %vm1661_vm0, %v1662_v11 }
 0x315   :  { %1431 = vmatprep.subr.bf16.mxu0 %v1660_v3 }
 0x318   :  { %1433 = vmatpush3.bf16.msra.mxu0 %v1755_v13 }
 0x319   :  { %1440 = vmatprep.subr.bf16.mxu0 %v1660_v3 }
 0x3e6   :  { %v406_v50 = vpop.f32.mrb[2].mxu0 }
 0x3e7   :  { %v411_v51 = vrot.slane %v406_v50, 7  ;;  %v1326_v52 = vpop.f32.mrb[3].mxu0 }
 0x3e9   :  { %v413_v53 = vadd.f32 %v411_v51, %v1785_v33 }
 0x3eb   :  { %1486 = vtanh.f32 %v413_v53  ;;  %v1229_v55 = vmul.f32 -1.442695, %v413_v53 }
 0x3ed   :  { %1488 = vpow2.f32 %v1229_v55 }
 0x3f5   :  { %v1487_v54 = vpop.eup %1486 }
 0x3f6   :  { %426 = vrot.lane.b32.xlu0 %v1487_v54, %s1663_s23 }
 0x3f7   :  { %v1489_v56 = vpop.eup %1488 }
 0x3f8   :  { %v417_v57 = vadd.f32 1.0, %v1489_v56 }
 0x3fa   :  { %1490 = vrcp.f32 %v417_v57 }
 0x404   :  { %v1491_v58 = vpop.eup %1490 }
 0x405   :  { %v424_v62 = vmul.f32 %v1491_v58, %v422_v61 }
 0x468   :  { %v427_v59 = vpop.permute.xlu0 %426 }
 0x469   :  { %v429_v60 = vmul.f32 %v1491_v58, %v427_v59 }
 0x46b   :  { %431 = vrot.lane.b32.xlu1 %v429_v60, %s1664_s24 }
 0x4dd   :  { %v432_v63 = vpop.permute.xlu1 %431 }
 0x4de   :  { %v434_v0 = vadd.f32 %v432_v63, %v424_v62 }
 0x4e0   :  { %1492 = vtanh.f32 %v434_v0  ;;  %v529_v21 = vrot.slane %v434_v0, 7 }
 0x4ea   :  { %v1493_v1 = vpop.eup %1492 }
 0x4eb   :  { %437 = vrot.lane.b32.xlu0 %v1493_v1, %s1663_s23 }
 0x55d   :  { %v438_v2 = vpop.permute.xlu0 %437 }
 0x55e   :  { %v440_v4 = vmul.f32 %v1491_v58, %v438_v2 }
 0x560   :  { %v442_v5 = vrot.slane %v440_v4, 1  ;;  %v1083_v28 = vsel %vm136_vm1, %v1791_v48, %v440_v4 }
 0x562   :  { %443 = vrot.lane.b32.xlu1 %v442_v5, %s1664_s24 }
 0x5d4   :  { %v444_v6 = vpop.permute.xlu1 %443 }
 0x5d5   :  { %1336 = vmatmul.mubr.msk.f32.vlgmr.msra.gmra.mrb[2].mxu1 %vm163_vm8, %v444_v6 }
 0x5d6   :  { %1436 = vmatpush3.bf16.msra.mxu1 %v1747_v8  ;;  %1357 = vmatprep.mubr.msk.f32.mxu1 %vm1661_vm0, %v1662_v11 }
 0x5d7   :  { %1437 = vmatprep.subr.bf16.mxu1 %v1660_v3 }
 0x5da   :  { %1439 = vmatpush3.bf16.msra.mxu1 %v1755_v13 }
 0x5db   :  { %1446 = vmatprep.subr.bf16.mxu1 %v1660_v3 }
 0x6a8   :  { %v513_v7 = vpop.f32.mrb[2].mxu1 }
 0x6a9   :  { %v518_v9 = vrot.slane %v513_v7, 6  ;;  %v1337_v10 = vpop.f32.mrb[3].mxu1 }
 0x6ab   :  { %v520_v12 = vadd.f32 %v518_v9, %v1785_v33 }
 0x6ad   :  { %1494 = vtanh.f32 %v520_v12  ;;  %v1231_v15 = vmul.f32 -1.442695, %v520_v12 }
 0x6af   :  { %1496 = vpow2.f32 %v1231_v15 }
 0x6b7   :  { %v1495_v14 = vpop.eup %1494 }
 0x6b8   :  { %533 = vrot.lane.b32.xlu0 %v1495_v14, %s1663_s23 }
 0x6b9   :  { %v1497_v16 = vpop.eup %1496 }
 0x6ba   :  { %v524_v17 = vadd.f32 1.0, %v1497_v16 }
 0x6bc   :  { %1498 = vrcp.f32 %v524_v17 }
 0x6c6   :  { %v1499_v18 = vpop.eup %1498 }
 0x6c7   :  { %v531_v22 = vmul.f32 %v1499_v18, %v529_v21 }
 0x72a   :  { %v534_v19 = vpop.permute.xlu0 %533 }
 0x72b   :  { %v536_v20 = vmul.f32 %v1499_v18, %v534_v19 }
 0x72d   :  { %538 = vrot.lane.b32.xlu1 %v536_v20, %s1664_s24 }
 0x79f   :  { %v539_v23 = vpop.permute.xlu1 %538 }
 0x7a0   :  { %v541_v24 = vadd.f32 %v539_v23, %v531_v22 }
 0x7a2   :  { %1500 = vtanh.f32 %v541_v24  ;;  %v636_v44 = vrot.slane %v541_v24, 7 }
 0x7ac   :  { %v1501_v25 = vpop.eup %1500 }
 0x7ad   :  { %544 = vrot.lane.b32.xlu0 %v1501_v25, %s1663_s23 }
 0x81f   :  { %v545_v26 = vpop.permute.xlu0 %544 }
 0x820   :  { %v547_v27 = vmul.f32 %v1499_v18, %v545_v26 }
 0x822   :  { %v549_v29 = vrot.slane %v547_v27, 2  ;;  %v1084_v30 = vsel %vm138_vm2, %v1083_v28, %v547_v27 }
 0x824   :  { %550 = vrot.lane.b32.xlu1 %v549_v29, %s1664_s24 }
 0x896   :  { %v551_v31 = vpop.permute.xlu1 %550 }
 0x897   :  { %1347 = vmatmul.mubr.msk.f32.vlgmr.msra.gmra.mrb[4].mxu0 %vm163_vm8, %v551_v31 }
 0x898   :  { %1442 = vmatpush3.bf16.msra.mxu0 %v1747_v8  ;;  %1368 = vmatprep.mubr.msk.f32.mxu0 %vm1661_vm0, %v1662_v11 }
 0x899   :  { %1443 = vmatprep.subr.bf16.mxu0 %v1660_v3 }
 0x89c   :  { %1445 = vmatpush3.bf16.msra.mxu0 %v1755_v13 }
 0x89d   :  { %1452 = vmatprep.subr.bf16.mxu0 %v1660_v3 }
 0x96a   :  { %v620_v32 = vpop.f32.mrb[4].mxu0 }
 0x96b   :  { %v625_v34 = vrot.slane %v620_v32, 5  ;;  %v1348_v35 = vpop.f32.mrb[5].mxu0 }
 0x96d   :  { %v627_v36 = vadd.f32 %v625_v34, %v1785_v33 }
 0x96f   :  { %1502 = vtanh.f32 %v627_v36  ;;  %v1233_v38 = vmul.f32 -1.442695, %v627_v36 }
 0x971   :  { %1504 = vpow2.f32 %v1233_v38 }
 0x979   :  { %v1503_v37 = vpop.eup %1502 }
 0x97a   :  { %640 = vrot.lane.b32.xlu0 %v1503_v37, %s1663_s23 }
 0x97b   :  { %v1505_v39 = vpop.eup %1504 }
 0x97c   :  { %v631_v40 = vadd.f32 1.0, %v1505_v39 }
 0x97e   :  { %1506 = vrcp.f32 %v631_v40 }
 0x988   :  { %v1507_v41 = vpop.eup %1506 }
 0x989   :  { %v638_v45 = vmul.f32 %v1507_v41, %v636_v44 }
 0x9ec   :  { %v641_v42 = vpop.permute.xlu0 %640 }
 0x9ed   :  { %v643_v43 = vmul.f32 %v1507_v41, %v641_v42 }
 0x9ef   :  { %645 = vrot.lane.b32.xlu1 %v643_v43, %s1664_s24 }
 0xa61   :  { %v646_v46 = vpop.permute.xlu1 %645 }
 0xa62   :  { %v648_v47 = vadd.f32 %v646_v46, %v638_v45 }
 0xa64   :  { %1508 = vtanh.f32 %v648_v47  ;;  %v743_v1 = vrot.slane %v648_v47, 7 }
 0xa6e   :  { %v1509_v48 = vpop.eup %1508 }
 0xa6f   :  { %651 = vrot.lane.b32.xlu0 %v1509_v48, %s1663_s23 }
 0xae1   :  { %v652_v49 = vpop.permute.xlu0 %651 }
 0xae2   :  { %v654_v50 = vmul.f32 %v1507_v41, %v652_v49 }
 0xae4   :  { %v656_v51 = vrot.slane %v654_v50, 3  ;;  %v1085_v52 = vsel %vm140_vm3, %v1084_v30, %v654_v50 }
 0xae6   :  { %657 = vrot.lane.b32.xlu1 %v656_v51, %s1664_s24 }
 0xb58   :  { %v658_v53 = vpop.permute.xlu1 %657 }
 0xb59   :  { %1358 = vmatmul.mubr.msk.f32.vlgmr.msra.gmra.mrb[4].mxu1 %vm163_vm8, %v658_v53 }
 0xb5a   :  { %1448 = vmatpush3.bf16.msra.mxu1 %v1747_v8  ;;  %1379 = vmatprep.mubr.msk.f32.mxu1 %vm1661_vm0, %v1662_v11 }
 0xb5b   :  { %1449 = vmatprep.subr.bf16.mxu1 %v1660_v3 }
 0xb5e   :  { %1451 = vmatpush3.bf16.msra.mxu1 %v1755_v13 }
 0xb5f   :  { %1458 = vmatprep.subr.bf16.mxu1 %v1660_v3 }
 0xc2c   :  { %v727_v54 = vpop.f32.mrb[4].mxu1 }
 0xc2d   :  { %v732_v55 = vrot.slane %v727_v54, 4  ;;  %v1359_v56 = vpop.f32.mrb[5].mxu1 }
 0xc2f   :  { %v734_v57 = vadd.f32 %v732_v55, %v1785_v33 }
 0xc31   :  { %1510 = vtanh.f32 %v734_v57  ;;  %v1235_v59 = vmul.f32 -1.442695, %v734_v57 }
 0xc33   :  { %1512 = vpow2.f32 %v1235_v59 }
 0xc3b   :  { %v1511_v58 = vpop.eup %1510 }
 0xc3c   :  { %747 = vrot.lane.b32.xlu0 %v1511_v58, %s1663_s23 }
 0xc3d   :  { %v1513_v60 = vpop.eup %1512 }
 0xc3e   :  { %v738_v61 = vadd.f32 1.0, %v1513_v60 }
 0xc40   :  { %1514 = vrcp.f32 %v738_v61 }
 0xc4a   :  { %v1515_v62 = vpop.eup %1514 }
 0xc4b   :  { %v745_v2 = vmul.f32 %v1515_v62, %v743_v1 }
 0xcae   :  { %v748_v63 = vpop.permute.xlu0 %747 }
 0xcaf   :  { %v750_v0 = vmul.f32 %v1515_v62, %v748_v63 }
 0xcb1   :  { %752 = vrot.lane.b32.xlu1 %v750_v0, %s1664_s24 }
 0xd23   :  { %v753_v4 = vpop.permute.xlu1 %752 }
 0xd24   :  { %v755_v5 = vadd.f32 %v753_v4, %v745_v2 }
 0xd26   :  { %1516 = vtanh.f32 %v755_v5 }
 0xd30   :  { %v1517_v6 = vpop.eup %1516 }
 0xd31   :  { %758 = vrot.lane.b32.xlu0 %v1517_v6, %s1663_s23 }
 0xda3   :  { %v759_v7 = vpop.permute.xlu0 %758 }
 0xda4   :  { %v761_v9 = vmul.f32 %v1515_v62, %v759_v7  ;;  %v1091_v7 = vld [vmem:[#allocation9 + $0x8] sm:$0xff] }
 0xda6   :  { %v763_v10 = vrot.slane %v761_v9, 4  ;;  %v1086_v12 = vsel %vm142_vm4, %v1085_v52, %v761_v9  ;;  %v1092_v9 = vld [vmem:[#allocation9 + $0x10] sm:$0xff] }
 0xda8   :  { %764 = vrot.lane.b32.xlu1 %v763_v10, %s1664_s24 }
 0xe1a   :  { %v765_v14 = vpop.permute.xlu1 %764 }
 0xe1b   :  { %1369 = vmatmul.mubr.msk.f32.vlgmr.msra.gmra.mrb[6].mxu0 %vm163_vm8, %v765_v14 }
 0xe1c   :  { %1454 = vmatpush3.bf16.msra.mxu0 %v1747_v8  ;;  %1390 = vmatprep.mubr.msk.f32.mxu0 %vm1661_vm0, %v1662_v11 }
 0xe1d   :  { %1455 = vmatprep.subr.bf16.mxu0 %v1660_v3 }
 0xe20   :  { %1457 = vmatpush3.bf16.msra.mxu0 %v1755_v13  ;;  %v850_v13 = vrot.slane %v755_v5, 7 }
 0xeee   :  { %v834_v15 = vpop.f32.mrb[6].mxu0 }
 0xeef   :  { %v839_v16 = vrot.slane %v834_v15, 3  ;;  %v1370_v17 = vpop.f32.mrb[7].mxu0 }
 0xef1   :  { %v841_v18 = vadd.f32 %v839_v16, %v1785_v33 }
 0xef3   :  { %1518 = vtanh.f32 %v841_v18  ;;  %v1237_v20 = vmul.f32 -1.442695, %v841_v18 }
 0xef5   :  { %1520 = vpow2.f32 %v1237_v20  ;;  %v1242_v20 = vld [vmem:[#allocation9 + $0x20] ss:$0 sm:$0xff] }
 0xefd   :  { %v1519_v19 = vpop.eup %1518 }
 0xefe   :  { %854 = vrot.lane.b32.xlu0 %v1519_v19, %s1663_s23 }
 0xeff   :  { %v1521_v21 = vpop.eup %1520 }
 0xf00   :  { %v845_v8 = vadd.f32 1.0, %v1521_v21 }
 0xf02   :  { %1522 = vrcp.f32 %v845_v8 }
 0xf0c   :  { %v1523_v22 = vpop.eup %1522 }
 0xf0d   :  { %v852_v25 = vmul.f32 %v1523_v22, %v850_v13 }
 0xf70   :  { %v855_v23 = vpop.permute.xlu0 %854 }
 0xf71   :  { %v857_v24 = vmul.f32 %v1523_v22, %v855_v23 }
 0xf73   :  { %859 = vrot.lane.b32.xlu1 %v857_v24, %s1664_s24 }
 0xfe5   :  { %v860_v26 = vpop.permute.xlu1 %859 }
 0xfe6   :  { %v862_v27 = vadd.f32 %v860_v26, %v852_v25 }
 0xfe8   :  { %1524 = vtanh.f32 %v862_v27 }
 0xff2   :  { %v1525_v28 = vpop.eup %1524 }
 0xff3   :  { %865 = vrot.lane.b32.xlu0 %v1525_v28, %s1663_s23 }
0x1065   :  { %v866_v29 = vpop.permute.xlu0 %865 }
0x1066   :  { %v868_v30 = vmul.f32 %v1523_v22, %v866_v29 }
0x1068   :  { %v870_v31 = vrot.slane %v868_v30, 5  ;;  %v1087_v32 = vsel %vm144_vm5, %v1086_v12, %v868_v30  ;;  %v1093_v12 = vld [vmem:[#allocation9 + $0x18] sm:$0xff] }
0x1069   :  { %v1462_v14 = vpack.c.bf16 %v1093_v12, %v1092_v9 }
0x106a   :  { %871 = vrot.lane.b32.xlu1 %v870_v31, %s1664_s24 }
0x10dc   :  { %v872_v34 = vpop.permute.xlu1 %871 }
0x10dd   :  { %1380 = vmatmul.mubr.msk.f32.vlgmr.msra.gmra.mrb[6].mxu1 %vm163_vm8, %v872_v34 }
0x10de   :  { %1401 = vmatprep.mubr.msk.f32.mxu1 %vm1661_vm0, %v1662_v11  ;;  %v957_v11 = vrot.slane %v862_v27, 7 }
0x11b0   :  { %v941_v35 = vpop.f32.mrb[6].mxu1 }
0x11b1   :  { %v946_v36 = vrot.slane %v941_v35, 2  ;;  %v1381_v37 = vpop.f32.mrb[7].mxu1 }
0x11b3   :  { %v948_v38 = vadd.f32 %v946_v36, %v1785_v33 }
0x11b5   :  { %1526 = vtanh.f32 %v948_v38  ;;  %v1239_v40 = vmul.f32 -1.442695, %v948_v38 }
0x11b7   :  { %1528 = vpow2.f32 %v1239_v40 }
0x11bf   :  { %v1527_v39 = vpop.eup %1526 }
0x11c0   :  { %961 = vrot.lane.b32.xlu0 %v1527_v39, %s1663_s23 }
0x11c1   :  { %v1529_v41 = vpop.eup %1528 }
0x11c2   :  { %v952_v42 = vadd.f32 1.0, %v1529_v41 }
0x11c4   :  { %1530 = vrcp.f32 %v952_v42 }
0x11ce   :  { %v1531_v43 = vpop.eup %1530 }
0x11cf   :  { %v959_v46 = vmul.f32 %v1531_v43, %v957_v11 }
0x1232   :  { %v962_v44 = vpop.permute.xlu0 %961 }
0x1233   :  { %v964_v45 = vmul.f32 %v1531_v43, %v962_v44 }
0x1235   :  { %966 = vrot.lane.b32.xlu1 %v964_v45, %s1664_s24 }
0x12a7   :  { %v967_v47 = vpop.permute.xlu1 %966 }
0x12a8   :  { %v969_v48 = vadd.f32 %v967_v47, %v959_v46 }
0x12aa   :  { %1532 = vtanh.f32 %v969_v48  ;;  %v1064_v2 = vrot.slane %v969_v48, 7 }
0x12b4   :  { %v1533_v49 = vpop.eup %1532 }
0x12b5   :  { %972 = vrot.lane.b32.xlu0 %v1533_v49, %s1663_s23 }
0x1327   :  { %v973_v50 = vpop.permute.xlu0 %972 }
0x1328   :  { %v975_v51 = vmul.f32 %v1531_v43, %v973_v50 }
0x132a   :  { %v977_v52 = vrot.slane %v975_v51, 6  ;;  %v1088_v53 = vsel %vm146_vm6, %v1087_v32, %v975_v51 }
0x132c   :  { %978 = vrot.lane.b32.xlu1 %v977_v52, %s1664_s24 }
0x139e   :  { %v979_v54 = vpop.permute.xlu1 %978 }
0x139f   :  { %1391 = vmatmul.mubr.msk.f32.vlgmr.msra.gmra.mrb[8].mxu0 %vm163_vm8, %v979_v54 }
0x1472   :  { %v1048_v55 = vpop.f32.mrb[8].mxu0 }
0x1473   :  { %v1053_v56 = vrot.slane %v1048_v55, 1  ;;  %v1392_v57 = vpop.f32.mrb[9].mxu0 }
0x1475   :  { %v1055_v58 = vadd.f32 %v1053_v56, %v1785_v33  ;;  %v1090_v33 = vld [vmem:[#allocation9] sm:$0xff] }
0x1476   :  { %v1459_v10 = vpack.c.bf16 %v1091_v7, %v1090_v33 }
0x1477   :  { %1534 = vtanh.f32 %v1055_v58  ;;  %v1241_v60 = vmul.f32 -1.442695, %v1055_v58 }
0x1478   :  { %1460 = vmatpush3.bf16.msra.mxu1 %v1459_v10 }
0x1479   :  { %1536 = vpow2.f32 %v1241_v60  ;;  %1461 = vmatprep.subr.bf16.mxu1 %v1660_v3 }
0x147c   :  { %1463 = vmatpush3.bf16.msra.mxu1 %v1462_v14 }
0x1481   :  { %v1535_v59 = vpop.eup %1534 }
0x1482   :  { %1068 = vrot.lane.b32.xlu0 %v1535_v59, %s1663_s23 }
0x1483   :  { %v1537_v61 = vpop.eup %1536 }
0x1484   :  { %v1059_v62 = vadd.f32 1.0, %v1537_v61 }
0x1486   :  { %1538 = vrcp.f32 %v1059_v62 }
0x1490   :  { %v1539_v63 = vpop.eup %1538 }
0x1491   :  { %v1066_v4 = vmul.f32 %v1539_v63, %v1064_v2 }
0x14f4   :  { %v1069_v0 = vpop.permute.xlu0 %1068 }
0x14f5   :  { %v1071_v1 = vmul.f32 %v1539_v63, %v1069_v0 }
0x14f7   :  { %1073 = vrot.lane.b32.xlu1 %v1071_v1, %s1664_s24 }
0x1569   :  { %v1074_v5 = vpop.permute.xlu1 %1073 }
0x156a   :  { %v1076_v6 = vadd.f32 %v1074_v5, %v1066_v4 }
0x156c   :  { %1540 = vtanh.f32 %v1076_v6 }
0x1576   :  { %v1541_v15 = vpop.eup %1540 }
0x1577   :  { %1079 = vrot.lane.b32.xlu0 %v1541_v15, %s1663_s23 }
0x15e9   :  { %v1080_v16 = vpop.permute.xlu0 %1079 }
0x15ea   :  { %v1082_v17 = vmul.f32 %v1539_v63, %v1080_v16 }
0x15ec   :  { %v1089_v18 = vsel %vm148_vm7, %v1088_v53, %v1082_v17 }
0x15ed   :  { %1100 = vrot.lane.b32.xlu1 %v1089_v18, %s1664_s24 }
0x165f   :  { %v1101_v19 = vpop.permute.xlu1 %1100 }
0x1660   :  { %1402 = vmatmul.mubr.msk.f32.vlgmr.msra.gmra.mrb[8].mxu1 %vm163_vm8, %v1101_v19 }
0x1733   :  { %v1170_v21 = vpop.f32.mrb[8].mxu1 }
0x1734   :  { %v1171_v8 = vadd.f32 %v1242_v20, %v1170_v21  ;;  %v1403_v22 = vpop.f32.mrb[9].mxu1 }
0x1736   :  { %1174 = vmax.xlane.f32.xlu0 %v1171_v8 }
0x17c3   :  { %v1175_v23 = vpop.xlane.xlu0 %1174 }
0x17c4   :  { %v1176_v3 = vsub.f32 %v1171_v8, %v1175_v23 }
0x17c6   :  { %v1177_v24 = vmul.f32 1.442695, %v1176_v3 }
0x17c8   :  { %1542 = vpow2.f32 %v1177_v24 }
0x17d2   :  { %v1543_v13 = vpop.eup %1542 }
0x17d3   :  { %1179 = vadd.xlane.f32.xlu1 %v1543_v13 }
0x1860   :  { %v1180_v25 = vpop.xlane.xlu1 %1179 }
0x1861   :  { %1544 = vlog2.f32 %v1180_v25 }
0x186b   :  { %v1545_v26 = vpop.eup %1544 }
0x186c   :  { %v1182_v27 = vmul.f32 0.6931472, %v1545_v26 }
0x186e   :  { %v1183_v28 = vadd.f32 %v1182_v27, %v1175_v23 }
0x1870   :  { %v1184_v29 = vsub.f32 %v1171_v8, %v1183_v28 }
0x1872   :  { %1185 = vst [vmem:[#allocation10] sm:$0xff] %v1184_v29 }
0x1873   :  { %1633 = shalt.err (!%p1630_p3)
}
0x1874   :  { %s1634_s6 = scalar_lea.hbm %s1894_s4, 128 }
0x1875   :  { %p1635_p4 = scmp.ne.s32.totalorder %s1894_s4, %s1634_s6  ;;  %p1638_p5 = scmp.lt.u32.totalorder %s1634_s6, %s1894_s4 }
0x1877   :  { %p1640_p6 = pnand %p1638_p5, %p1635_p4 }
0x1879   :  { %1643 = shalt.err (!%p1640_p6)
}
0x187a   :  { %1195 = dma.vmem_to_hbm [thread:$0]  %s1193_s28, 128, %s1894_s4, [#allocation4]  }
0x187b   :  { %1650 = dma.done.wait [#allocation4], 128  }
0x187c   :  { %1651 = vsyncadd [#allocation4], 4294967168 }
0x187d   :  { %1199 = vsyncpa [#allocation3], 1 }
0x187e   :  { %1200 = vsyncpa [#allocation8], 1 }
0x187f   :  { %1201 = vsyncpa [#allocation4], 1 }
0x1880   :  { %1202 = vsyncpa [#allocation5], 1 }

</bundles_post_ra>
